<compile_context>
chip_gen: v7x
topology: tpu7x:2x2x1
jax: 0.10.0
libtpu: 0.0.40
codegen_flags: <defaults>
</compile_context>

<pallas_src>
import functools

import jax
import jax.numpy as jnp
from jax.experimental import pallas as pl
from jax.experimental.pallas import tpu as pltpu


def _feature_kernel(code_ref, val_ref, pos_ref, t_ref, p_ref, out_ref, *, E, P):
    # Per-sample scalar streams, feature-major: [1, T] with T (tile_n) on lanes.
    code = code_ref[...]                        # [1, T]  (0.0 or 1.0)
    val = val_ref[...]                          # [1, T]
    pos = pos_ref[...]                          # [1, T]
    t = t_ref[...]                              # [1, T]

    # Packed parameter columns: [W, 8], feature index on sublanes.
    emb0 = p_ref[0:E, 0:1]                      # embedding row 0 (+ noise[:E])
    emb1 = p_ref[0:E, 1:2]                      # embedding row 1 (+ noise[:E])
    vw = p_ref[0:E, 2:3]                        # value_linear weight
    vb = p_ref[0:E, 3:4]                        # value_linear bias (+ noise[E:2E])
    pw = p_ref[0:P, 4:5]                        # position_linear weight
    pb = p_ref[0:P, 5:6]                        # position_linear bias
    invf = p_ref[0:E, 6:7]                      # 1 / 10000**(i/E)

    # Embedding lookup: table has only two rows -> broadcast select.
    # NOTE: codes are binary per the module (nn.Embedding(2, E)); any code
    # that is not exactly 0.0 maps to row 1.
    method_embed = jnp.where(code == 0.0, emb0, emb1)          # [E, T]

    # Linear(1, D) == scalar * row + bias (lane-dense FMAs).
    value_embed = val * vw + vb                                 # [E, T]
    pos_embed = pos * pw + pb                                   # [P, T]

    # Time encoding: cos on even feature index, sin on odd (exact parity with
    # the reference; the extra transcendental is free, kernel is HBM-bound).
    angle = t * invf                                            # [E, T]
    feat = jax.lax.broadcasted_iota(jnp.int32, (E, 1), 0)       # [E, 1]
    time_embed = jnp.where(feat % 2 == 0, jnp.cos(angle), jnp.sin(angle))

    # Sublane-aligned concat (all offsets multiples of 8 for E=16, P=8), then a
    # single XLU transpose and one dense block store in the module's layout.
    combined = jnp.concatenate(
        [method_embed, value_embed, pos_embed, time_embed], axis=0)  # [3E+P, T]
    out_ref[...] = combined.T.astype(out_ref.dtype)                  # [T, 3E+P]


def _pack_params(params, E, P):
    """Fold noise and pack all parameter vectors into one [W, 8] column block."""
    W = max(E, P)
    W_pad = ((W + 7) // 8) * 8

    def col(v, length):
        v = jnp.asarray(v, jnp.float32).reshape(-1)
        return jnp.pad(v, (0, W_pad - length))[:, None]         # [W_pad, 1]

    noise = jnp.asarray(params["noise"], jnp.float32).reshape(-1)
    cols = [
        col(params["emb_table"][0] + noise[:E], E),
        col(params["emb_table"][1] + noise[:E], E),
        col(params["value_w"].reshape(-1), E),
        col(params["value_b"].reshape(-1) + noise[E:2 * E], E),
        col(params["pos_w"].reshape(-1), P),
        col(params["pos_b"].reshape(-1), P),
        col(params["inv_freq"].reshape(-1), E),
        col(jnp.zeros((W_pad,), jnp.float32), W_pad),           # spare column
    ]
    return jnp.concatenate(cols, axis=1)                        # [W_pad, 8]


def learnable_feature_generator(method_code, value, position, time_seconds,
                                params, *, tile_n=8192, out_dtype=jnp.float32):
    """Pallas forward. Inputs are 1-D arrays of length N; output is [N, 3E+P]."""
    N = method_code.shape[0]
    E = params["emb_table"].shape[1]
    P = params["pos_w"].shape[1]
    out_dim = 3 * E + P

    packed = _pack_params(params, E, P)
    Wp = packed.shape[0]

    # Lane-axis tile: multiple of 128, capped by (128-padded) N.
    n_pad128 = ((N + 127) // 128) * 128
    tile_n = max(128, min((tile_n // 128) * 128, n_pad128))
    n_pad = pl.cdiv(N, tile_n) * tile_n

    # Feature-major streams: free (N,) -> (1, N) reshape, N on the lane axis.
    def prep(v):
        v = jnp.asarray(v, jnp.float32).reshape(1, N)
        if n_pad != N:
            v = jnp.pad(v, ((0, 0), (0, n_pad - N)))
        return v

    code = prep(method_code)
    val = prep(value)
    pos = prep(position)
    t = prep(time_seconds)

    stream_spec = pl.BlockSpec((1, tile_n), lambda i: (0, i))

    out_padded = pl.pallas_call(
        functools.partial(_feature_kernel, E=E, P=P),
        out_shape=jax.ShapeDtypeStruct((n_pad, out_dim), out_dtype),
        grid=(n_pad // tile_n,),
        in_specs=[
            stream_spec, stream_spec, stream_spec, stream_spec,
            pl.BlockSpec((Wp, 8), lambda i: (0, 0)),   # constant -> DMA'd once
        ],
        out_specs=pl.BlockSpec((tile_n, out_dim), lambda i: (i, 0)),
        compiler_params=pltpu.CompilerParams(
            dimension_semantics=("parallel",),
            vmem_limit_bytes=40 * 1024 * 1024),
    )(code, val, pos, t, packed)

    return out_padded[:N]


def init_params(key, embedding_dim=16, position_dim=8, sigma=0.1):
    k1, k2, k3, k4, k5, k6 = jax.random.split(key, 6)
    E, P = embedding_dim, position_dim
    params = {
        # nn.Embedding(2, E)
        "emb_table": jax.random.normal(k1, (2, E), jnp.float32),
        # nn.Linear(1, E): weight [E,1] stored transposed as [1,E], bias -> [1,E]
        "value_w": jax.random.normal(k2, (1, E), jnp.float32) * 0.5,
        "value_b": jax.random.normal(k3, (1, E), jnp.float32) * 0.1,
        # nn.Linear(1, P)
        "pos_w": jax.random.normal(k4, (1, P), jnp.float32) * 0.5,
        "pos_b": jax.random.normal(k5, (1, P), jnp.float32) * 0.1,
        # fixed gaussian noise of size 2E (np.random.normal in the module)
        "noise": sigma * jax.random.normal(k6, (1, 2 * E), jnp.float32),
        # time-encoding inverse frequencies: 1 / 10000**(i/E)
        "inv_freq": (1.0 / (10000.0 ** (jnp.arange(E, dtype=jnp.float32) / E))
                     ).reshape(1, E),
    }
    # NOTE: time_linear from __init__ is unused in forward(), so it is omitted.
    return params


def _reference(method_code, value, position, time_seconds, params):
    """Pure-JAX reference mirroring the PyTorch forward."""
    E = params["emb_table"].shape[1]
    method_embed = params["emb_table"][method_code.astype(jnp.int32)]
    value_embed = value.astype(jnp.float32)[:, None] * params["value_w"] + params["value_b"]
    pos_embed = position.astype(jnp.float32)[:, None] * params["pos_w"] + params["pos_b"]
    angles = time_seconds.astype(jnp.float32)[:, None] * params["inv_freq"]
    i = jnp.arange(E)
    time_embed = jnp.where((i % 2) == 0, jnp.cos(angles), jnp.sin(angles))
    combined = jnp.concatenate([method_embed, value_embed], axis=-1)
    return jnp.concatenate([combined + params["noise"], pos_embed, time_embed], axis=-1)


if __name__ == "__main__":
    key = jax.random.PRNGKey(0)

    E, P = 16, 8
    params = init_params(key, embedding_dim=E, position_dim=P, sigma=0.1)

    def run_case(n, tile_n):
        ka, kb, kc, kd = jax.random.split(jax.random.fold_in(key, n), 4)
        method_code = jax.random.randint(ka, (n,), 0, 2, dtype=jnp.int32)
        value = jax.random.normal(kb, (n,), jnp.float32)
        position = jax.random.randint(kc, (n,), 0, 100, dtype=jnp.int32).astype(jnp.float32)
        time_seconds = jax.random.uniform(kd, (n,), jnp.float32, 0.0, 100.0)

        out = learnable_feature_generator(method_code, value, position,
                                          time_seconds, params, tile_n=tile_n)
        out = jax.block_until_ready(out)
        ref = _reference(method_code, value, position, time_seconds, params)
        assert out.shape == (n, 3 * E + P)
        assert jnp.allclose(out, ref, atol=1e-5, rtol=1e-5), \
            f"mismatch (max err {jnp.max(jnp.abs(out - ref))})"

    # Small case matching the module's intended per-sample usage.
    run_case(8, tile_n=8192)
    # Non-divisible N with multiple grid steps to exercise padding + pipeline.
    run_case(300, tile_n=128)

    print("KERNEL_OK")
</pallas_src>

<mosaic_0001>
module attributes {stable_mosaic.version = 11 : i64} {
  func.func @_feature_kernel(%arg0: i32, %arg1: memref<1x128xf32, #tpu.memory_space<vmem>>, %arg2: memref<1x128xf32, #tpu.memory_space<vmem>>, %arg3: memref<1x128xf32, #tpu.memory_space<vmem>>, %arg4: memref<1x128xf32, #tpu.memory_space<vmem>>, %arg5: memref<16x8xf32, #tpu.memory_space<vmem>>, %arg6: memref<128x56xf32, #tpu.memory_space<vmem>>) attributes {dimension_semantics = [#tpu.dimension_semantics<parallel>], iteration_bounds = array<i64: 1>, scalar_prefetch = 0 : i64, scratch_operands = 0 : i64, tpu.core_type = #tpu.core_type<tc>, window_params = [{transform_indices = @transform_0, window_bounds = array<i64: 1, 128>}, {transform_indices = @transform_1, window_bounds = array<i64: 1, 128>}, {transform_indices = @transform_2, window_bounds = array<i64: 1, 128>}, {transform_indices = @transform_3, window_bounds = array<i64: 1, 128>}, {pipeline_mode = #tpu.pipeline_mode<synchronous>, transform_indices = @transform_4, window_bounds = array<i64: 16, 8>}, {transform_indices = @transform_5, window_bounds = array<i64: 128, 56>}]} {
    %c0 = arith.constant 0 : index
    %c0_0 = arith.constant 0 : index
    %0 = vector.load %arg1[%c0, %c0_0] : memref<1x128xf32, #tpu.memory_space<vmem>>, vector<1x128xf32>
    %c0_1 = arith.constant 0 : index
    %c0_2 = arith.constant 0 : index
    %1 = vector.load %arg2[%c0_1, %c0_2] : memref<1x128xf32, #tpu.memory_space<vmem>>, vector<1x128xf32>
    %c0_3 = arith.constant 0 : index
    %c0_4 = arith.constant 0 : index
    %2 = vector.load %arg3[%c0_3, %c0_4] : memref<1x128xf32, #tpu.memory_space<vmem>>, vector<1x128xf32>
    %c0_5 = arith.constant 0 : index
    %c0_6 = arith.constant 0 : index
    %3 = vector.load %arg4[%c0_5, %c0_6] : memref<1x128xf32, #tpu.memory_space<vmem>>, vector<1x128xf32>
    %c0_7 = arith.constant 0 : index
    %c0_8 = arith.constant 0 : index
    %4 = vector.load %arg5[%c0_7, %c0_8] : memref<16x8xf32, #tpu.memory_space<vmem>>, vector<16x1xf32>
    %c0_9 = arith.constant 0 : index
    %c1 = arith.constant 1 : index
    %5 = vector.load %arg5[%c0_9, %c1] : memref<16x8xf32, #tpu.memory_space<vmem>>, vector<16x1xf32>
    %c0_10 = arith.constant 0 : index
    %c2 = arith.constant 2 : index
    %6 = vector.load %arg5[%c0_10, %c2] : memref<16x8xf32, #tpu.memory_space<vmem>>, vector<16x1xf32>
    %c0_11 = arith.constant 0 : index
    %c3 = arith.constant 3 : index
    %7 = vector.load %arg5[%c0_11, %c3] : memref<16x8xf32, #tpu.memory_space<vmem>>, vector<16x1xf32>
    %c0_12 = arith.constant 0 : index
    %c4 = arith.constant 4 : index
    %8 = vector.load %arg5[%c0_12, %c4] : memref<16x8xf32, #tpu.memory_space<vmem>>, vector<8x1xf32>
    %c0_13 = arith.constant 0 : index
    %c5 = arith.constant 5 : index
    %9 = vector.load %arg5[%c0_13, %c5] : memref<16x8xf32, #tpu.memory_space<vmem>>, vector<8x1xf32>
    %c0_14 = arith.constant 0 : index
    %c6 = arith.constant 6 : index
    %10 = vector.load %arg5[%c0_14, %c6] : memref<16x8xf32, #tpu.memory_space<vmem>>, vector<16x1xf32>
    %cst = arith.constant 0.000000e+00 : f32
    %11 = vector.broadcast %cst : f32 to vector<1x128xf32>
    %12 = arith.cmpf oeq, %0, %11 : vector<1x128xf32>
    %13 = vector.shape_cast %12 : vector<1x128xi1> to vector<1x128xi1>
    %14 = vector.broadcast %13 : vector<1x128xi1> to vector<16x128xi1>
    %15 = vector.shape_cast %4 : vector<16x1xf32> to vector<16x1xf32>
    %16 = vector.broadcast %15 : vector<16x1xf32> to vector<16x128xf32>
    %17 = vector.shape_cast %5 : vector<16x1xf32> to vector<16x1xf32>
    %18 = vector.broadcast %17 : vector<16x1xf32> to vector<16x128xf32>
    %19 = arith.select %14, %16, %18 : vector<16x128xi1>, vector<16x128xf32>
    %20 = vector.broadcast %1 : vector<1x128xf32> to vector<16x128xf32>
    %21 = vector.broadcast %6 : vector<16x1xf32> to vector<16x128xf32>
    %22 = arith.mulf %20, %21 : vector<16x128xf32>
    %23 = vector.broadcast %7 : vector<16x1xf32> to vector<16x128xf32>
    %24 = arith.addf %22, %23 : vector<16x128xf32>
    %25 = vector.broadcast %2 : vector<1x128xf32> to vector<8x128xf32>
    %26 = vector.broadcast %8 : vector<8x1xf32> to vector<8x128xf32>
    %27 = arith.mulf %25, %26 : vector<8x128xf32>
    %28 = vector.broadcast %9 : vector<8x1xf32> to vector<8x128xf32>
    %29 = arith.addf %27, %28 : vector<8x128xf32>
    %30 = vector.broadcast %3 : vector<1x128xf32> to vector<16x128xf32>
    %31 = vector.broadcast %10 : vector<16x1xf32> to vector<16x128xf32>
    %32 = arith.mulf %30, %31 : vector<16x128xf32>
    %33 = tpu.iota {dimensions = array<i32: 0>} : vector<16x1xi32>
    %c2_i32 = arith.constant 2 : i32
    %c0_i32 = arith.constant 0 : i32
    %34 = arith.cmpi eq, %c2_i32, %c0_i32 : i32
    %c1_i32 = arith.constant 1 : i32
    %35 = arith.select %34, %c1_i32, %c2_i32 : i32
    %36 = vector.broadcast %35 : i32 to vector<16x1xi32>
    %37 = arith.remsi %33, %36 : vector<16x1xi32>
    %c0_i32_15 = arith.constant 0 : i32
    %38 = vector.broadcast %c0_i32_15 : i32 to vector<16x1xi32>
    %39 = arith.cmpi ne, %37, %38 : vector<16x1xi32>
    %c0_i32_16 = arith.constant 0 : i32
    %40 = vector.broadcast %c0_i32_16 : i32 to vector<16x1xi32>
    %41 = arith.cmpi slt, %37, %40 : vector<16x1xi32>
    %c0_i32_17 = arith.constant 0 : i32
    %42 = arith.cmpi slt, %35, %c0_i32_17 : i32
    %43 = vector.broadcast %42 : i1 to vector<16x1xi1>
    %44 = vector.broadcast %43 : vector<16x1xi1> to vector<16x1xi1>
    %45 = arith.xori %41, %44 : vector<16x1xi1>
    %46 = arith.andi %45, %39 : vector<16x1xi1>
    %47 = vector.broadcast %35 : i32 to vector<16x1xi32>
    %48 = arith.addi %37, %47 : vector<16x1xi32>
    %49 = arith.select %46, %48, %37 : vector<16x1xi1>, vector<16x1xi32>
    %c0_i32_18 = arith.constant 0 : i32
    %50 = vector.broadcast %c0_i32_18 : i32 to vector<16x1xi32>
    %51 = arith.cmpi eq, %49, %50 : vector<16x1xi32>
    %52 = math.cos %32 : vector<16x128xf32>
    %53 = math.sin %32 : vector<16x128xf32>
    %54 = vector.shape_cast %51 : vector<16x1xi1> to vector<16x1xi1>
    %55 = vector.broadcast %54 : vector<16x1xi1> to vector<16x128xi1>
    %56 = arith.select %55, %52, %53 : vector<16x128xi1>, vector<16x128xf32>
    %57 = tpu.concatenate %19, %24, %29, %56 in 0 : vector<16x128xf32>, vector<16x128xf32>, vector<8x128xf32>, vector<16x128xf32> -> vector<56x128xf32>
    %58 = tpu.transpose %57, [1, 0] : vector<56x128xf32> -> vector<128x56xf32>
    %c0_19 = arith.constant 0 : index
    %c0_20 = arith.constant 0 : index
    %59 = vector.load %arg6[%c0_19, %c0_20] : memref<128x56xf32, #tpu.memory_space<vmem>>, vector<128x56xf32>
    tpu.vector_store %arg6[%c0_19, %c0_20], %58 {strides = array<i32>} : memref<128x56xf32, #tpu.memory_space<vmem>>, vector<128x56xf32>,
    return
  }
  func.func @transform_0(%arg0: i32) -> (i32, i32) {
    %c0_i32 = arith.constant 0 : i32
    %c0_i32_0 = arith.constant 0 : i32
    return %c0_i32, %arg0 : i32, i32
  }
  func.func @transform_1(%arg0: i32) -> (i32, i32) {
    %c0_i32 = arith.constant 0 : i32
    %c0_i32_0 = arith.constant 0 : i32
    return %c0_i32, %arg0 : i32, i32
  }
  func.func @transform_2(%arg0: i32) -> (i32, i32) {
    %c0_i32 = arith.constant 0 : i32
    %c0_i32_0 = arith.constant 0 : i32
    return %c0_i32, %arg0 : i32, i32
  }
  func.func @transform_3(%arg0: i32) -> (i32, i32) {
    %c0_i32 = arith.constant 0 : i32
    %c0_i32_0 = arith.constant 0 : i32
    return %c0_i32, %arg0 : i32, i32
  }
  func.func @transform_4(%arg0: i32) -> (i32, i32) {
    %c0_i32 = arith.constant 0 : i32
    %c0_i32_0 = arith.constant 0 : i32
    %c0_i32_1 = arith.constant 0 : i32
    return %c0_i32, %c0_i32_0 : i32, i32
  }
  func.func @transform_5(%arg0: i32) -> (i32, i32) {
    %c0_i32 = arith.constant 0 : i32
    %c0_i32_0 = arith.constant 0 : i32
    return %arg0, %c0_i32 : i32, i32
  }
}

</mosaic_0001>

<bundles_post_ra>
// kernel: tpu_custom_call.1
= control target key start
LH: loop header
LB: loop body
LE: loop exit
PB: predicated region body
PF: predicated region fallthrough
CT: control target
= control target key end

     0   :  { %v673_v0 = vmov 6   ;;  %v674_v2 = vmov 0   ;;  %v675_v4 = vmov 1   ;;  %v676_v5 = vmov 2   ;;  %s919_s4 = inlined_call_operand.vmem [shape: f32[16,8], index: 4, kind: input, shape index: {}]   ;;  %s920_s0 = inlined_call_operand.vmem [shape: f32[1,128], index: 0, kind: input, shape index: {}]   ;;  %s921_s3 = inlined_call_operand.vmem [shape: f32[1,128], index: 3, kind: input, shape index: {}]   ;;  %s922_s1 = inlined_call_operand.vmem [shape: f32[1,128], index: 1, kind: input, shape index: {}]   ;;  %s923_s2 = inlined_call_operand.vmem [shape: f32[1,128], index: 2, kind: input, shape index: {}]   ;;  %s924_s5 = inlined_call_operand.vmem [shape: f32[128,56], index: 5, kind: output, shape index: {}]  }
   0x1   :  { %654 = vset.pattern.permute.xlu0 %v673_v0  ;;  %v24_v1 = vld [vmem:[%s919_s4] sm:$0xff]  ;;  %655 = vset.pattern.permute.xlu1 %v674_v2  ;;  %v25_v3 = vld [vmem:[%s919_s4 + $0x8] sm:$0xff]  ;;  %v677_v6 = vmov 3   ;;  %v678_v7 = vmov 4   ;;  %v679_v8 = vmov 5   ;;  %v28_v9 = vlaneseq }
   0x2   :  { %102 = vperm.xlu0 %654, %v24_v1   ;;  %35 = vperm.xlu1 %655, %v24_v1   ;;  %v20_v10 = vld [vmem:[%s920_s0] sm:$0x1]  ;;  %v680_v43 = vmov 683565275   ;;  %v681_v45 = vmov 2475754826  }
   0x3   :  { %v726_v11 = vshrl.u32 %v28_v9, 7  ;;  %vm26_vm0 = vcmp.eq.f32.partialorder %v20_v10, 0.0  ;;  %v615_v14 = vld [vmem:[%s921_s3] ss:$0 sm:$0xff]  ;;  %v682_v47 = vmov 2131351028  }
   0x4   :  { %v27_v13 = vsel %vm26_vm0, 1, %v674_v2  ;;  %v683_v49 = vmov 2102212464   ;;  %v684_v51 = vmov 920167782  }
   0x5   :  { %v30_v12 = vsub.s32 0, %v726_v11  ;;  %v685_v59 = vmov 1326507024   ;;  %v613_v10 = vld [vmem:[%s922_s1] ss:$0 sm:$0xff] }
   0x6   :  { %106 = vperm.xlu0 %654, %v25_v3   ;;  %656 = vset.pattern.permute.xlu1 %v675_v4 }
   0x7   :  { %44 = vperm.xlu1 %656, %v24_v1   ;;  %v732_v15 = vrot.slane %v27_v13, %v30_v12 }
   0x9   :  { %vm32_vm1 = vcmp.eq.s32.totalorder %v732_v15, 1 }
   0xa   :  { %657 = vset.pattern.permute.xlu0 %v676_v5 }
   0xb   :  { %658 = vset.pattern.permute.xlu1 %v674_v2  ;;  %60 = vperm.xlu0 %657, %v24_v1  }
   0xc   :  { %40 = vperm.xlu1 %658, %v25_v3  }
   0xf   :  { %64 = vperm.xlu0 %657, %v25_v3  }
  0x10   :  { %659 = vset.pattern.permute.xlu1 %v675_v4 }
  0x11   :  { %48 = vperm.xlu1 %659, %v25_v3  }
  0x13   :  { %661 = vset.pattern.permute.xlu0 %v677_v6 }
  0x14   :  { %74 = vperm.xlu0 %661, %v25_v3  }
  0x15   :  { %660 = vset.pattern.permute.xlu1 %v677_v6 }
  0x16   :  { %70 = vperm.xlu1 %660, %v24_v1  }
  0x1a   :  { %662 = vset.pattern.permute.xlu1 %v678_v7 }
  0x1b   :  { %86 = vperm.xlu1 %662, %v24_v1  }
  0x1f   :  { %663 = vset.pattern.permute.xlu1 %v679_v8 }
  0x20   :  { %91 = vperm.xlu1 %663, %v24_v1  }
  0x81   :  { %v103_v16 = vpop.permute.xlu0 %102  ;;  %v36_v17 = vpop.permute.xlu1 %35 }
  0x82   :  { %v734_v18 = vmul.f32 %v615_v14, %v103_v16 }
  0x84   :  { %v140_v19 = vand.u32 2147483647, %v734_v18  ;;  %v143_v20 = vand.u32 2139095040, %v734_v18  ;;  %vm142_vm0 = vcmp.lt.s32.totalorder %v734_v18, 0 }
  0x85   :  { %v107_v21 = vpop.permute.xlu0 %106 }
  0x86   :  { %v144_v22 = vshrl.u32 %v143_v20, 23  ;;  %v739_v23 = vmul.f32 %v615_v14, %v107_v21  ;;  %v45_v24 = vpop.permute.xlu1 %44  ;;  %v147_v25 = vand.u32 8388607, %v140_v19 }
  0x87   :  { %v51_v26 = vsel %vm32_vm1, %v36_v17, %v45_v24 }
  0x88   :  { %v616_v27 = vadd.s32 4294967169, %v144_v22  ;;  %v243_v28 = vand.u32 2147483647, %v739_v23  ;;  %560 = vxpose.xlu0.b32.start [1/7] (short) %v51_v26, 128  ;;  %v246_v29 = vand.u32 2139095040, %v739_v23  ;;  %v148_v31 = vor.u32 8388608, %v147_v25 }
  0x8a   :  { %v150_v30 = vadd.s32 1, %v616_v27  ;;  %v247_v32 = vshrl.u32 %v246_v29, 23  ;;  %v250_v33 = vand.u32 8388607, %v243_v28  ;;  %v749_v39 = vshll.u32 %v148_v31, 8  ;;  %v61_v1 = vpop.permute.xlu0 %60 }
  0x8b   :  { %v41_v34 = vpop.permute.xlu1 %40  ;;  %v67_v26 = vmul.f32 %v613_v10, %v61_v1 }
  0x8c   :  { %vm151_vm2 = vcmp.gt.s32.totalorder %v150_v30, 0  ;;  %v620_v36 = vadd.s32 4294967169, %v247_v32  ;;  %v251_v40 = vor.u32 8388608, %v250_v33 }
  0x8d   :  { %v152_v35 = vsel %vm151_vm2, %v150_v30, 0  ;;  %vm245_vm2 = vcmp.lt.s32.totalorder %v739_v23, 0 }
  0x8e   :  { %v153_v37 = vshrl.u32 %v152_v35, 5  ;;  %v154_v38 = vand.u32 31, %v152_v35  ;;  %v253_v41 = vadd.s32 1, %v620_v36  ;;  %v772_v25 = vshll.u32 %v251_v40, 8  ;;  %v65_v32 = vpop.permute.xlu0 %64 }
  0x8f   :  { %v68_v36 = vmul.f32 %v613_v10, %v65_v32 }
  0x90   :  { %v155_v42 = vsub.s32 32, %v154_v38  ;;  %v157_v44 = vshll.u32 %v680_v43, %v154_v38  ;;  %v160_v46 = vshll.u32 %v681_v45, %v154_v38  ;;  %v163_v48 = vshll.u32 %v682_v47, %v154_v38  ;;  %v49_v57 = vpop.permute.xlu1 %48 }
  0x91   :  { %v166_v50 = vshll.u32 %v683_v49, %v154_v38  ;;  %v169_v52 = vshll.u32 %v684_v51, %v154_v38  ;;  %vm172_vm3 = vcmp.lt.s32.totalorder %v153_v37, 1  ;;  %vm173_vm4 = vcmp.lt.s32.totalorder %v153_v37, 2 }
  0x92   :  { %v156_v53 = vshrl.u32 %v680_v43, %v155_v42  ;;  %v158_v54 = vshrl.u32 %v681_v45, %v155_v42  ;;  %v161_v55 = vshrl.u32 %v682_v47, %v155_v42  ;;  %v164_v56 = vshrl.u32 %v683_v49, %v155_v42 }
  0x93   :  { %v167_v58 = vshrl.u32 %v684_v51, %v155_v42  ;;  %v170_v60 = vshrl.u32 %v685_v59, %v155_v42  ;;  %vm174_vm5 = vcmp.lt.s32.totalorder %v153_v37, 3  ;;  %vm175_vm6 = vcmp.lt.s32.totalorder %v153_v37, 4 }
  0x94   :  { %v159_v61 = vor.u32 %v158_v54, %v157_v44  ;;  %v162_v62 = vor.u32 %v161_v55, %v160_v46  ;;  %v165_v63 = vor.u32 %v164_v56, %v163_v48  ;;  %vm254_vm7 = vcmp.gt.s32.totalorder %v253_v41, 0 }
  0x95   :  { %v168_v2 = vor.u32 %v167_v58, %v166_v50  ;;  %v171_v3 = vor.u32 %v170_v60, %v169_v52  ;;  %v255_v4 = vsel %vm254_vm7, %v253_v41, 0  ;;  %v52_v5 = vsel %vm32_vm1, %v41_v34, %v49_v57  ;;  %v71_v35 = vpop.permute.xlu1 %70 }
  0x96   :  { %v176_v6 = vsel %vm172_vm3, %v156_v53, %v159_v61  ;;  %v177_v7 = vsel %vm175_vm6, %v165_v63, 2102212464  ;;  %v180_v8 = vsel %vm172_vm3, %v159_v61, %v162_v62  ;;  %v184_v9 = vsel %vm172_vm3, %v162_v62, %v165_v63  ;;  %561 = vxpose.xlu0.b32.cont [2/7] (short) %v52_v5, 128  ;;  %v75_v61 = vpop.permute.xlu0 %74 }
  0x97   :  { %v178_v12 = vsel %vm174_vm5, %v162_v62, %v177_v7  ;;  %v181_v13 = vsel %vm175_vm6, %v168_v2, 920167782  ;;  %v185_v14 = vsel %vm175_vm6, %v171_v3, 1326507024  ;;  %v765_v15 = vshrl.u32 %v255_v4, 5 }
  0x98   :  { %v179_v16 = vsel %vm173_vm4, %v176_v6, %v178_v12  ;;  %v182_v17 = vsel %vm174_vm5, %v165_v63, %v181_v13  ;;  %v186_v20 = vsel %vm174_vm5, %v168_v2, %v185_v14  ;;  %v257_v21 = vand.u32 31, %v255_v4  ;;  %v614_v4 = vld [vmem:[%s923_s2] ss:$0 sm:$0xff] }
  0x99   :  { %v183_v22 = vsel %vm173_vm4, %v180_v8, %v182_v17  ;;  %v187_v24 = vsel %vm173_vm4, %v184_v9, %v186_v20  ;;  %v195_v33 = vmul.u32 %v749_v39, %v179_v16  ;;  %vm275_vm8 = vcmp.lt.s32.totalorder %v765_v15, 1 }
  0x9a   :  { %v775_v27 = vmul.u32.u64.low %v749_v39, %v187_v24  ;;  %v776_v29 = vmul.u32.u64.high %v749_v39, %v187_v24, %v775_v27  ;;  %v779_v30 = vmul.u32.u64.low %v749_v39, %v183_v22  ;;  %v780_v31 = vmul.u32.u64.high %v749_v39, %v183_v22, %v779_v30  ;;  %v87_v56 = vpop.permute.xlu1 %86 }
  0x9b   :  { %v258_v34 = vsub.s32 32, %v257_v21  ;;  %v260_v37 = vshll.u32 %v680_v43, %v257_v21  ;;  %v263_v38 = vshll.u32 %v681_v45, %v257_v21  ;;  %v266_v40 = vshll.u32 %v682_v47, %v257_v21 }
  0x9c   :  { %v269_v41 = vshll.u32 %v683_v49, %v257_v21  ;;  %v272_v48 = vshll.u32 %v684_v51, %v257_v21  ;;  %vm197_vm9 = vc.u32 %v776_v29, %v779_v30  ;;  %v198_v50 = vadd.s32 1, %v780_v31 }
  0x9d   :  { %v261_v42 = vshrl.u32 %v681_v45, %v258_v34  ;;  %v264_v44 = vshrl.u32 %v682_v47, %v258_v34  ;;  %v267_v46 = vshrl.u32 %v683_v49, %v258_v34  ;;  %v270_v39 = vshrl.u32 %v684_v51, %v258_v34 }
  0x9e   :  { %vm276_vm10 = vcmp.lt.s32.totalorder %v765_v15, 2  ;;  %v273_v55 = vshrl.u32 %v685_v59, %v258_v34  ;;  %v199_v57 = vsel %vm197_vm9, %v198_v50, %v780_v31  ;;  %vm278_vm11 = vcmp.lt.s32.totalorder %v765_v15, 4 }
  0x9f   :  { %v262_v52 = vor.u32 %v261_v42, %v260_v37  ;;  %v265_v53 = vor.u32 %v264_v44, %v263_v38  ;;  %v268_v54 = vor.u32 %v267_v46, %v266_v40  ;;  %v271_v58 = vor.u32 %v270_v39, %v269_v41  ;;  %v92_v14 = vpop.permute.xlu1 %91 }
  0xa0   :  { %v77_v45 = vadd.f32 %v71_v35, %v67_v26  ;;  %v200_v47 = vadd.s32 %v199_v57, %v195_v33  ;;  %v259_v49 = vshrl.u32 %v680_v43, %v258_v34  ;;  %v274_v60 = vor.u32 %v273_v55, %v272_v48 }
  0xa1   :  { %v280_v51 = vsel %vm278_vm11, %v268_v54, 2102212464  ;;  %vm277_vm12 = vcmp.lt.s32.totalorder %v765_v15, 3  ;;  %v283_v59 = vsel %vm275_vm8, %v262_v52, %v265_v53  ;;  %v284_v62 = vsel %vm278_vm11, %v271_v58, 920167782 }
  0xa2   :  { %v287_v63 = vsel %vm275_vm8, %v265_v53, %v268_v54  ;;  %562 = vxpose.xlu0.b32.cont [3/7] (short) %v77_v45, 128  ;;  %v201_v1 = vadd.s32 536870912, %v200_v47  ;;  %v279_v43 = vsel %vm275_vm8, %v259_v49, %v262_v52  ;;  %v285_v2 = vsel %vm277_vm12, %v268_v54, %v284_v62 }
  0xa3   :  { %v288_v3 = vsel %vm278_vm11, %v274_v60, 1326507024  ;;  %v281_v5 = vsel %vm277_vm12, %v265_v53, %v280_v51  ;;  %v286_v6 = vsel %vm276_vm10, %v283_v59, %v285_v2  ;;  %v78_v8 = vadd.f32 %v75_v61, %v68_v36 }
  0xa4   :  { %v289_v7 = vsel %vm277_vm12, %v271_v58, %v288_v3  ;;  %v202_v9 = vshrl.u32 %v201_v1, 30  ;;  %v814_v12 = vmul.u32.u64.low %v772_v25, %v286_v6  ;;  %v815_v13 = vmul.u32.u64.high %v772_v25, %v286_v6, %v814_v12 }
  0xa5   :  { %v290_v10 = vsel %vm276_vm10, %v287_v63, %v289_v7  ;;  %v89_v20 = vmul.f32 %v614_v4, %v87_v56  ;;  %v282_v22 = vsel %vm276_vm10, %v279_v43, %v281_v5  ;;  %v196_v44 = vadd.s32 %v779_v30, %v776_v29 }
  0xa6   :  { %v818_v16 = vmul.u32.u64.low %v772_v25, %v290_v10  ;;  %v819_v17 = vmul.u32.u64.high %v772_v25, %v290_v10, %v818_v16  ;;  %563 = vxpose.xlu0.b32.cont [4/7] (short) %v78_v8, 128  ;;  %v203_v21 = vshll.u32 %v202_v9, 30  ;;  %v301_v27 = vadd.s32 1, %v815_v13 }
  0xa7   :  { %v94_v24 = vadd.f32 %v92_v14, %v89_v20  ;;  %v298_v31 = vmul.u32 %v772_v25, %v282_v22  ;;  %v226_v60 = vsub.s32 4, %v202_v9  ;;  %vm141_vm1 = vcmp.le.f32.partialorder %v140_v19, 0.7853982 }
  0xa8   :  { %v204_v26 = vsub.s32 %v200_v47, %v203_v21  ;;  %vm300_vm13 = vc.u32 %v819_v17, %v814_v12  ;;  %v299_v29 = vadd.s32 %v814_v12, %v819_v17  ;;  %v118_v16 = vand.u32 1, %v726_v11 }
  0xa9   :  { %v302_v33 = vsel %vm300_vm13, %v301_v27, %v815_v13  ;;  %v227_v2 = vsel %vm142_vm0, %v226_v60, %v202_v9  ;;  %vm244_vm3 = vcmp.le.f32.partialorder %v243_v28, 0.7853982  ;;  %vm232_vm11 = vweird.f32 %v734_v18 }
  0xaa   :  { %564 = vxpose.xlu0.b32.cont [5/7] (short) %v94_v24, 128  ;;  %v206_v32 = vsub.s32 0, %v204_v26  ;;  %v303_v34 = vadd.s32 %v302_v33, %v298_v31  ;;  %v229_v7 = vsel %vm141_vm1, 0, %v227_v2  ;;  %vm839_vm4 = vcmp.eq.s32.totalorder %v118_v16, 0 }
  0xab   :  { %v439_v12 = vadd.s32 3, %v229_v7  ;;  %v233_v20 = vand.u32 3, %v229_v7 }
  0xac   :  { %v617_v35 = vmin.u32 %v206_v32, %v204_v26  ;;  %v304_v36 = vadd.s32 536870912, %v303_v34  ;;  %v113_v32 = vadd.s32 8, %v726_v11 }
  0xad   :  { %v440_v19 = vand.u32 3, %v439_v12  ;;  %vm238_vm5 = vcmp.eq.s32.totalorder %v233_v20, 2  ;;  %vm235_vm7 = vcmp.eq.s32.totalorder %v233_v20, 0  ;;  %vm234_vm9 = vcmp.lt.s32.totalorder %v233_v20, 2 }
  0xae   :  { %v208_v37 = vclz %v617_v35  ;;  %v305_v38 = vshrl.u32 %v304_v36, 30 }
  0xaf   :  { %vm445_vm6 = vcmp.eq.s32.totalorder %v440_v19, 2  ;;  %vm442_vm8 = vcmp.eq.s32.totalorder %v440_v19, 0  ;;  %vm441_vm10 = vcmp.lt.s32.totalorder %v440_v19, 2 }
  0xb0   :  { %v618_v40 = vadd.s32 4294967294, %v208_v37  ;;  %v306_v15 = vshll.u32 %v305_v38, 30  ;;  %v329_v14 = vsub.s32 4, %v305_v38 }
  0xb2   :  { %vm619_vm14 = vcmp.lt.s32.totalorder %v618_v40, 0  ;;  %v307_v42 = vsub.s32 %v303_v34, %v306_v15  ;;  %v330_v21 = vsel %vm245_vm2, %v329_v14, %v305_v38 }
  0xb3   :  { %v211_v41 = vsel %vm619_vm14, 0, %v618_v40  ;;  %v332_v34 = vsel %vm244_vm3, 0, %v330_v21 }
  0xb4   :  { %v212_v25 = vsub.s32 32, %v211_v41  ;;  %v216_v46 = vsub.s32 4294967266, %v211_v41  ;;  %v309_v48 = vsub.s32 0, %v307_v42  ;;  %v213_v50 = vshll.u32 %v204_v26, %v211_v41 }
  0xb5   :  { %v543_v15 = vadd.s32 3, %v332_v34 }
  0xb6   :  { %v214_v39 = vshrl.u32 %v196_v44, %v212_v25  ;;  %v217_v52 = vadd.s32 127, %v216_v46  ;;  %v621_v53 = vmin.u32 %v309_v48, %v307_v42  ;;  %v125_v44 = vand.u32 1, %v113_v32 }
  0xb7   :  { %v336_v25 = vand.u32 3, %v332_v34  ;;  %v544_v46 = vand.u32 3, %v543_v15 }
  0xb8   :  { %v215_v54 = vor.u32 %v214_v39, %v213_v50  ;;  %v218_v55 = vshll.u32 %v217_v52, 23  ;;  %v311_v56 = vclz %v621_v53  ;;  %vm847_vm12 = vcmp.eq.s32.totalorder %v125_v44, 0 }
  0xb9   :  { %vm341_vm13 = vcmp.eq.s32.totalorder %v336_v25, 2  ;;  %vm549_vm14 = vcmp.eq.s32.totalorder %v544_v46, 2 }
  0xba   :  { %v219_v57 = vor.u32 4788187, %v218_v55  ;;  %v622_v58 = vadd.s32 4294967294, %v311_v56  ;;  %v222_v47 = vcvt.s32.f32 %v215_v54 }
  0xbc   :  { %v220_v45 = vand.u32 2147483647, %v219_v57  ;;  %vm623_vm15 = vcmp.lt.s32.totalorder %v622_v58, 0 }
  0xbd   :  { %v314_v51 = vsel %vm623_vm15, 0, %v622_v58  ;;  %vm338_vm15 = vcmp.eq.s32.totalorder %v336_v25, 0 }
  0xbe   :  { %v223_v49 = vmul.f32 %v222_v47, %v220_v45  ;;  %v315_v30 = vsub.s32 32, %v314_v51  ;;  %v319_v61 = vsub.s32 4294967266, %v314_v51  ;;  %v316_v62 = vshll.u32 %v307_v42, %v314_v51 }
  0xc0   :  { %v224_v59 = vxor.u32 2147483648, %v223_v49  ;;  %v317_v63 = vshrl.u32 %v299_v29, %v315_v30  ;;  %v320_v1 = vadd.s32 127, %v319_v61 }
  0xc2   :  { %v225_v43 = vsel %vm142_vm0, %v224_v59, %v223_v49  ;;  %v318_v4 = vor.u32 %v317_v63, %v316_v62  ;;  %v321_v5 = vshll.u32 %v320_v1, 23  ;;  %vm546_vm0 = vcmp.eq.s32.totalorder %v544_v46, 0 }
  0xc3   :  { %v228_v3 = vsel %vm141_vm1, %v734_v18, %v225_v43  ;;  %vm337_vm1 = vcmp.lt.s32.totalorder %v336_v25, 2 }
  0xc4   :  { %665 = vcosq.f32 %v228_v3  ;;  %v322_v6 = vor.u32 4788187, %v321_v5  ;;  %v325_v10 = vcvt.s32.f32 %v318_v4 }
  0xc5   :  { %667 = vsinq.f32 %v228_v3 }
  0xc6   :  { %v323_v8 = vand.u32 2147483647, %v322_v6 }
  0xc8   :  { %v326_v13 = vmul.f32 %v325_v10, %v323_v8 }
  0xca   :  { %v327_v17 = vxor.u32 2147483648, %v326_v13 }
  0xcc   :  { %v328_v9 = vsel %vm245_vm2, %v327_v17, %v326_v13  ;;  %vm545_vm2 = vcmp.lt.s32.totalorder %v544_v46, 2 }
  0xcd   :  { %v331_v24 = vsel %vm244_vm3, %v739_v23, %v328_v9  ;;  %vm335_vm3 = vweird.f32 %v739_v23 }
  0xce   :  { %v666_v22 = vpop.eup %665  ;;  %669 = vcosq.f32 %v331_v24 }
  0xcf   :  { %v668_v27 = vpop.eup %667  ;;  %v239_v31 = vxor.u32 2147483648, %v666_v22  ;;  %671 = vsinq.f32 %v331_v24 }
  0xd0   :  { %v236_v33 = vxor.u32 2147483648, %v668_v27 }
  0xd1   :  { %v240_v28 = vsel %vm238_vm5, %v239_v31, %v668_v27  ;;  %v447_v35 = vsel %vm445_vm6, %v239_v31, %v668_v27 }
  0xd2   :  { %v237_v36 = vsel %vm235_vm7, %v666_v22, %v236_v33  ;;  %v444_v37 = vsel %vm442_vm8, %v666_v22, %v236_v33 }
  0xd3   :  { %v241_v38 = vsel %vm234_vm9, %v237_v36, %v240_v28  ;;  %v448_v40 = vsel %vm441_vm10, %v444_v37, %v447_v35 }
  0xd4   :  { %v242_v41 = vsel %vm232_vm11, nan, %v241_v38  ;;  %v449_v42 = vsel %vm232_vm11, nan, %v448_v40 }
  0xd5   :  { %v558_v11 = vsel %vm839_vm4, %v242_v41, %v449_v42  ;;  %vm592_vm4 = vcmask 457728  }
  0xd6   :  { %565 = vxpose.xlu0.b32.cont [6/7] (short) %v558_v11, 128 }
  0xd8   :  { %v670_v48 = vpop.eup %669 }
  0xd9   :  { %v672_v50 = vpop.eup %671  ;;  %v342_v39 = vxor.u32 2147483648, %v670_v48 }
  0xda   :  { %v339_v18 = vxor.u32 2147483648, %v672_v50 }
  0xdb   :  { %v343_v53 = vsel %vm341_vm13, %v342_v39, %v672_v50  ;;  %v551_v54 = vsel %vm549_vm14, %v342_v39, %v672_v50 }
  0xdc   :  { %v340_v55 = vsel %vm338_vm15, %v670_v48, %v339_v18  ;;  %v548_v56 = vsel %vm546_vm0, %v670_v48, %v339_v18 }
  0xdd   :  { %v344_v57 = vsel %vm337_vm1, %v340_v55, %v343_v53  ;;  %v552_v58 = vsel %vm545_vm2, %v548_v56, %v551_v54 }
  0xde   :  { %v345_v45 = vsel %vm335_vm3, nan, %v344_v57  ;;  %v553_v47 = vsel %vm335_vm3, nan, %v552_v58 }
  0xdf   :  { %v559_v49 = vsel %vm847_vm12, %v345_v45, %v553_v47 }
  0xe0   :  { %566 = vxpose.xlu0.b32.end [7/7] (short) %v559_v49, 128 }
 0x109   :  { %664 = vset.pattern.permute.xlu0 %v673_v0 }
 0x148   :  { %v576_v60 = vpop.trf.xlu0 }
 0x149   :  { %593 = vst.msk [vmem:[%s924_s5] sm:$0xff] %vm592_vm4, %v576_v60 }
 0x14c   :  { %v577_v51 = vpop.trf.xlu0 }
 0x14d   :  { %594 = vst.msk [vmem:[%s924_s5 + $0x8] sm:$0xff] %vm592_vm4, %v577_v51 }
 0x150   :  { %v578_v23 = vpop.trf.xlu0 }
 0x151   :  { %595 = vst.msk [vmem:[%s924_s5 + $0x10] sm:$0xff] %vm592_vm4, %v578_v23 }
 0x154   :  { %v579_v0 = vpop.trf.xlu0 }
 0x155   :  { %596 = vst.msk [vmem:[%s924_s5 + $0x18] sm:$0xff] %vm592_vm4, %v579_v0 }
 0x158   :  { %v580_v29 = vpop.trf.xlu0 }
 0x159   :  { %597 = vst.msk [vmem:[%s924_s5 + $0x20] sm:$0xff] %vm592_vm4, %v580_v29 }
 0x15c   :  { %v581_v30 = vpop.trf.xlu0 }
 0x15d   :  { %598 = vst.msk [vmem:[%s924_s5 + $0x28] sm:$0xff] %vm592_vm4, %v581_v30 }
 0x160   :  { %v582_v61 = vpop.trf.xlu0 }
 0x161   :  { %599 = vst.msk [vmem:[%s924_s5 + $0x30] sm:$0xff] %vm592_vm4, %v582_v61 }
 0x164   :  { %v583_v59 = vpop.trf.xlu0 }
 0x165   :  { %600 = vst.msk [vmem:[%s924_s5 + $0x38] sm:$0xff] %vm592_vm4, %v583_v59 }
 0x168   :  { %v584_v62 = vpop.trf.xlu0 }
 0x169   :  { %601 = vst.msk [vmem:[%s924_s5 + $0x40] sm:$0xff] %vm592_vm4, %v584_v62 }
 0x16c   :  { %v585_v63 = vpop.trf.xlu0 }
 0x16d   :  { %602 = vst.msk [vmem:[%s924_s5 + $0x48] sm:$0xff] %vm592_vm4, %v585_v63 }
 0x170   :  { %v586_v1 = vpop.trf.xlu0 }
 0x171   :  { %603 = vst.msk [vmem:[%s924_s5 + $0x50] sm:$0xff] %vm592_vm4, %v586_v1 }
 0x174   :  { %v587_v43 = vpop.trf.xlu0 }
 0x175   :  { %604 = vst.msk [vmem:[%s924_s5 + $0x58] sm:$0xff] %vm592_vm4, %v587_v43 }
 0x178   :  { %v588_v2 = vpop.trf.xlu0 }
 0x179   :  { %605 = vst.msk [vmem:[%s924_s5 + $0x60] sm:$0xff] %vm592_vm4, %v588_v2 }
 0x17c   :  { %v589_v3 = vpop.trf.xlu0 }
 0x17d   :  { %606 = vst.msk [vmem:[%s924_s5 + $0x68] sm:$0xff] %vm592_vm4, %v589_v3 }
 0x180   :  { %v590_v4 = vpop.trf.xlu0 }
 0x181   :  { %607 = vst.msk [vmem:[%s924_s5 + $0x70] sm:$0xff] %vm592_vm4, %v590_v4 }
 0x184   :  { %v591_v5 = vpop.trf.xlu0 }
 0x185   :  { %608 = vst.msk [vmem:[%s924_s5 + $0x78] sm:$0xff] %vm592_vm4, %v591_v5 }

</bundles_post_ra>
